<compile_context>
chip_gen: v6e
topology: v6e:2x2x1
jax: 0.10.0
libtpu: 0.0.40
codegen_flags: <defaults>
</compile_context>

<pallas_src>
import jax
import jax.numpy as jnp
from jax.experimental import pallas as pl
from jax.experimental.pallas import tpu as pltpu

# 1-D Gaussian taps; the 5x5 kernel is their outer product (matches torch code).
_K1D = (0.05, 0.25, 0.4, 0.25, 0.05)
_EPS = 1e-3


def _blur_matrix(n):
    """(n, n) banded matrix M with (M @ v)[i] = sum_d k[d+2] * v[clamp(i+d, 0, n-1)].

    Row-blur of a plane is  M_H @ img ; column-blur is  img @ M_W.T .
    Replicate padding is folded into the boundary rows.
    """
    m = [[0.0] * n for _ in range(n)]
    for i in range(n):
        for d in range(-2, 3):
            j = min(max(i + d, 0), n - 1)
            m[i][j] += _K1D[d + 2]
    return jnp.array(m, dtype=jnp.float32)


def _edge_loss_kernel(a_ref, bm_ref, x_ref, y_ref, out_ref):
    a = a_ref[...]      # (H, H) fused row-blur matrix (gh2 @ gh)
    bm = bm_ref[...]    # (W, W) fused col-blur matrix (gwt @ gw2t)

    # Laplacian is linear: lap(x) - lap(y) = lap(x - y).
    d0 = x_ref[...].astype(jnp.float32) - y_ref[...].astype(jnp.float32)
    tb, h, w = d0.shape

    # Column (width) blur:  d0 @ Bm  for all TB planes in one contraction.
    if h % 8 == 0:
        # Free reshape: merges leading dims onto the sublane axis.
        t1 = jnp.dot(d0.reshape(tb * h, w), bm,
                     preferred_element_type=jnp.float32).reshape(tb, h, w)
    else:
        t1 = jnp.einsum('bhk,bkw->bhw', d0, jnp.broadcast_to(bm, (tb, w, w)),
                        preferred_element_type=jnp.float32)

    # Row (height) blur:  A @ t1  per plane, as one batched contraction.
    t2 = jnp.einsum('bhk,bkw->bhw', jnp.broadcast_to(a, (tb, h, h)), t1,
                    preferred_element_type=jnp.float32)

    d = d0 - t2
    # Per-grid-step partial Charbonnier sum (each step owns its output block,
    # so the grid axis stays "parallel"; the mean is a tiny wrapper reduction).
    out_ref[...] = jnp.zeros_like(out_ref) + jnp.sum(jnp.sqrt(d * d + _EPS * _EPS))


def _plan(bc, h, w, in_itemsize):
    """Pick planes-per-step TB and a VMEM limit — chip- and dtype-aware."""
    try:
        cap = int(pltpu.get_tpu_info().vmem_capacity_bytes)
    except Exception:
        cap = 64 * 1024 * 1024            # conservative (v7x-sized) fallback
    budget = max(16 * 1024 * 1024, cap // 2)

    const_bytes = 2 * (h * h + w * w) * 4          # A, Bm (double-buffered)

    def need(tb):
        blocks = 2 * 2 * tb * h * w * in_itemsize  # x,y blocks, double-buffered
        temps = 4 * tb * h * w * 4                 # f32 d0/t1/t2/d live values
        return const_bytes + blocks + temps

    divisors = [d for d in range(1, bc + 1) if bc % d == 0]
    feasible = [d for d in divisors if need(d) <= budget] or [1]
    even_nb = [d for d in feasible if (bc // d) % 2 == 0]  # both TCs busy (v7x)
    multi_nb = [d for d in feasible if (bc // d) >= 2]     # pipeline overlap
    pool = even_nb or multi_nb or feasible
    tb = max(pool)

    vmem_limit = int(min(max(budget, need(tb) + 8 * 1024 * 1024),
                         (cap * 15) // 16))
    return tb, vmem_limit


@jax.jit
def edge_loss(x, y):
    """x, y: (N, C, H, W) arrays of the same shape. Returns scalar loss."""
    B, C, H, W = x.shape
    assert x.shape == y.shape, "only the equal-resolution branch is implemented"
    BC = B * C
    xf = x.reshape(BC, H, W)   # native dtype; upcast happens inside the kernel
    yf = y.reshape(BC, H, W)

    # Banded Gaussian matrices with replicate padding folded in, fused with the
    # even-pixel *4 upsample mask:  lap(img) = img - A @ img @ Bm.
    gh = _blur_matrix(H)                       # row blur:   gh @ img
    gwt = _blur_matrix(W).T                    # col blur:   img @ gwt
    even_h = (jnp.arange(H) % 2 == 0).astype(jnp.float32)
    even_w = (jnp.arange(W) % 2 == 0).astype(jnp.float32)
    gh2 = 4.0 * gh * even_h[None, :]           # zero odd columns, fold the x4
    gw2t = gwt * even_w[:, None]               # zero odd rows
    a_mat = jnp.dot(gh2, gh, preferred_element_type=jnp.float32)    # (H, H)
    b_mat = jnp.dot(gwt, gw2t, preferred_element_type=jnp.float32)  # (W, W)

    TB, vmem_limit = _plan(BC, H, W, x.dtype.itemsize)
    nb = BC // TB

    partials = pl.pallas_call(
        _edge_loss_kernel,
        out_shape=jax.ShapeDtypeStruct((nb, 1, 1), jnp.float32),
        grid_spec=pltpu.PrefetchScalarGridSpec(
            num_scalar_prefetch=0,
            grid=(nb,),
            in_specs=[
                pl.BlockSpec((H, H), lambda i: (0, 0)),        # A  (resident)
                pl.BlockSpec((W, W), lambda i: (0, 0)),        # Bm (resident)
                pl.BlockSpec((TB, H, W), lambda i: (i, 0, 0)),
                pl.BlockSpec((TB, H, W), lambda i: (i, 0, 0)),
            ],
            out_specs=pl.BlockSpec((1, 1, 1), lambda i: (i, 0, 0)),
        ),
        compiler_params=pltpu.CompilerParams(
            dimension_semantics=("parallel",),
            vmem_limit_bytes=vmem_limit),
    )(a_mat, b_mat, xf, yf)

    return jnp.sum(partials) / (BC * H * W)


# ---------------------------------------------------------------------------
# Pure-JAX reference (direct replicate-pad 25-tap formulation, no Pallas).
# ---------------------------------------------------------------------------
def _conv_gauss_ref(img):
    H, W = img.shape
    top = img[0:1, :]
    bot = img[H - 1:H, :]
    p = jnp.concatenate([top, top, img, bot, bot], axis=0)
    left = p[:, 0:1]
    right = p[:, W - 1:W]
    p = jnp.concatenate([left, left, p, right, right], axis=1)
    out = jnp.zeros((H, W), jnp.float32)
    for di in range(5):
        for dj in range(5):
            out = out + (_K1D[di] * _K1D[dj]) * p[di:di + H, dj:dj + W]
    return out


def _laplacian_ref(img):
    H, W = img.shape
    filtered = _conv_gauss_ref(img)
    rows = jax.lax.broadcasted_iota(jnp.int32, (H, W), 0)
    cols = jax.lax.broadcasted_iota(jnp.int32, (H, W), 1)
    even = ((rows % 2) == 0) & ((cols % 2) == 0)
    new_filter = jnp.where(even, filtered * 4.0, 0.0)
    return img - _conv_gauss_ref(new_filter)


def _edge_loss_ref(x, y):
    B, C, H, W = x.shape
    xf = x.reshape(B * C, H, W).astype(jnp.float32)
    yf = y.reshape(B * C, H, W).astype(jnp.float32)
    lx = jax.vmap(_laplacian_ref)(xf)
    ly = jax.vmap(_laplacian_ref)(yf)
    d = lx - ly
    return jnp.mean(jnp.sqrt(d * d + _EPS * _EPS))


if __name__ == "__main__":
    key = jax.random.PRNGKey(0)
    kx, ky = jax.random.split(key)
    # EdgeLoss hardcodes 3 channels (gaussian kernel repeated 3x, groups=3).
    B, C, H, W = 2, 3, 16, 16
    x = jax.random.uniform(kx, (B, C, H, W), dtype=jnp.float32)
    y = jax.random.uniform(ky, (B, C, H, W), dtype=jnp.float32)

    out = jax.block_until_ready(edge_loss(x, y))
    ref = jax.block_until_ready(_edge_loss_ref(x, y))
    assert jnp.allclose(out, ref, rtol=1e-3, atol=1e-6), (out, ref)

    print("KERNEL_OK")
</pallas_src>

<mosaic_0001>
module attributes {stable_mosaic.version = 11 : i64} {
  func.func @_edge_loss_kernel(%arg0: i32, %arg1: memref<16x16xf32, #tpu.memory_space<vmem>>, %arg2: memref<16x16xf32, #tpu.memory_space<vmem>>, %arg3: memref<3x16x16xf32, #tpu.memory_space<vmem>>, %arg4: memref<3x16x16xf32, #tpu.memory_space<vmem>>, %arg5: memref<1x1x1xf32, #tpu.memory_space<vmem>>) attributes {dimension_semantics = [#tpu.dimension_semantics<parallel>], iteration_bounds = array<i64: 2>, scalar_prefetch = 0 : i64, scratch_operands = 0 : i64, tpu.core_type = #tpu.core_type<tc>, window_params = [{pipeline_mode = #tpu.pipeline_mode<synchronous>, transform_indices = @transform_0, window_bounds = array<i64: 16, 16>}, {pipeline_mode = #tpu.pipeline_mode<synchronous>, transform_indices = @transform_1, window_bounds = array<i64: 16, 16>}, {transform_indices = @transform_2, window_bounds = array<i64: 3, 16, 16>}, {transform_indices = @transform_3, window_bounds = array<i64: 3, 16, 16>}, {transform_indices = @transform_4, window_bounds = array<i64: 1, 1, 1>}]} {
    %c0 = arith.constant 0 : index
    %c0_0 = arith.constant 0 : index
    %0 = vector.load %arg1[%c0, %c0_0] : memref<16x16xf32, #tpu.memory_space<vmem>>, vector<16x16xf32>
    %c0_1 = arith.constant 0 : index
    %c0_2 = arith.constant 0 : index
    %1 = vector.load %arg2[%c0_1, %c0_2] : memref<16x16xf32, #tpu.memory_space<vmem>>, vector<16x16xf32>
    %c0_3 = arith.constant 0 : index
    %c0_4 = arith.constant 0 : index
    %c0_5 = arith.constant 0 : index
    %2 = vector.load %arg3[%c0_3, %c0_4, %c0_5] : memref<3x16x16xf32, #tpu.memory_space<vmem>>, vector<3x16x16xf32>
    %c0_6 = arith.constant 0 : index
    %c0_7 = arith.constant 0 : index
    %c0_8 = arith.constant 0 : index
    %3 = vector.load %arg4[%c0_6, %c0_7, %c0_8] : memref<3x16x16xf32, #tpu.memory_space<vmem>>, vector<3x16x16xf32>
    %4 = arith.subf %2, %3 : vector<3x16x16xf32>
    %5 = vector.shape_cast %4 : vector<3x16x16xf32> to vector<48x16xf32>
    %cst = arith.constant dense<0.000000e+00> : vector<48x16xf32>
    %6 = tpu.matmul %5, %1, %cst {dimension_numbers = #tpu.dot_dimension_numbers<[1], [0], [0], [1], [0, 0, 1, 1], [], []>} : vector<48x16xf32>, vector<16x16xf32>, vector<48x16xf32> -> vector<48x16xf32>
    %7 = vector.shape_cast %6 : vector<48x16xf32> to vector<3x16x16xf32>
    %8 = vector.shape_cast %0 : vector<16x16xf32> to vector<1x16x16xf32>
    %9 = vector.broadcast %8 : vector<1x16x16xf32> to vector<3x16x16xf32>
    "tpu.trace_start"() <{level = 10 : i32, message = "bhk,bkw->bhw"}> : () -> ()
    %cst_9 = arith.constant dense<0.000000e+00> : vector<3x16x16xf32>
    %10 = tpu.matmul %9, %7, %cst_9 {dimension_numbers = #tpu.dot_dimension_numbers<[2], [1], [1], [2], [0, 0, 0, 1, 1, 2], [0], [0]>} : vector<3x16x16xf32>, vector<3x16x16xf32>, vector<3x16x16xf32> -> vector<3x16x16xf32>
    "tpu.trace_stop"() : () -> ()
    %11 = arith.subf %4, %10 : vector<3x16x16xf32>
    %cst_10 = arith.constant 0.000000e+00 : f32
    %12 = vector.broadcast %cst_10 : f32 to vector<1x1x1xf32>
    %13 = arith.mulf %11, %11 : vector<3x16x16xf32>
    %cst_11 = arith.constant 9.99999997E-7 : f32
    %14 = vector.broadcast %cst_11 : f32 to vector<3x16x16xf32>
    %15 = arith.addf %13, %14 : vector<3x16x16xf32>
    %16 = math.sqrt %15 : vector<3x16x16xf32>
    %17 = vector.shape_cast %16 : vector<3x16x16xf32> to vector<1x3x16x16xf32>
    %cst_12 = arith.constant dense<0.000000e+00> : vector<1xf32>
    %18 = vector.multi_reduction <add>, %17, %cst_12 [1, 2, 3] : vector<1x3x16x16xf32> to vector<1xf32>
    %19 = vector.shape_cast %18 : vector<1xf32> to vector<1x1x1x1xf32>
    %20 = vector.extract %19[0, 0, 0, 0] : f32 from vector<1x1x1x1xf32>
    %21 = vector.broadcast %20 : f32 to vector<1x1x1xf32>
    %22 = arith.addf %12, %21 : vector<1x1x1xf32>
    %c0_13 = arith.constant 0 : index
    %c0_14 = arith.constant 0 : index
    %c0_15 = arith.constant 0 : index
    %23 = vector.load %arg5[%c0_13, %c0_14, %c0_15] : memref<1x1x1xf32, #tpu.memory_space<vmem>>, vector<1x1x1xf32>
    tpu.vector_store %arg5[%c0_13, %c0_14, %c0_15], %22 {strides = array<i32>} : memref<1x1x1xf32, #tpu.memory_space<vmem>>, vector<1x1x1xf32>,
    return
  }
  func.func @transform_0(%arg0: i32) -> (i32, i32) {
    %c0_i32 = arith.constant 0 : i32
    %c0_i32_0 = arith.constant 0 : i32
    %c0_i32_1 = arith.constant 0 : i32
    return %c0_i32, %c0_i32_0 : i32, i32
  }
  func.func @transform_1(%arg0: i32) -> (i32, i32) {
    %c0_i32 = arith.constant 0 : i32
    %c0_i32_0 = arith.constant 0 : i32
    %c0_i32_1 = arith.constant 0 : i32
    return %c0_i32, %c0_i32_0 : i32, i32
  }
  func.func @transform_2(%arg0: i32) -> (i32, i32, i32) {
    %c0_i32 = arith.constant 0 : i32
    %c0_i32_0 = arith.constant 0 : i32
    %c0_i32_1 = arith.constant 0 : i32
    return %arg0, %c0_i32, %c0_i32_0 : i32, i32, i32
  }
  func.func @transform_3(%arg0: i32) -> (i32, i32, i32) {
    %c0_i32 = arith.constant 0 : i32
    %c0_i32_0 = arith.constant 0 : i32
    %c0_i32_1 = arith.constant 0 : i32
    return %arg0, %c0_i32, %c0_i32_0 : i32, i32, i32
  }
  func.func @transform_4(%arg0: i32) -> (i32, i32, i32) {
    %c0_i32 = arith.constant 0 : i32
    %c0_i32_0 = arith.constant 0 : i32
    %c0_i32_1 = arith.constant 0 : i32
    return %arg0, %c0_i32, %c0_i32_0 : i32, i32, i32
  }
}

</mosaic_0001>

<bundles_post_ra>
// kernel: edge_loss.1
= control target key start
LH: loop header
LB: loop body
LE: loop exit
PB: predicated region body
PF: predicated region fallthrough
CT: control target
= control target key end

     0   :  { %9 = vsyncpa [#allocation3], 0  ;;  %s1135_s0 = inlined_call_operand.vmem [shape: f32[16,16], index: 0, kind: input, shape index: {}]   ;;  %s1136_s1 = inlined_call_operand.vmem [shape: f32[16,16], index: 1, kind: input, shape index: {}]   ;;  %s1137_s2 = inlined_call_operand.vmem [shape: f32[6,16,16], index: 2, kind: input, shape index: {}]   ;;  %s1138_s3 = inlined_call_operand.hbm [shape: f32[6,16,16], index: 3, kind: input, shape index: {}]   ;;  %s1139_s4 = inlined_call_operand.vmem [shape: f32[2,1,1], index: 4, kind: output, shape index: {}]  }
   0x1   :  { %11 = vsyncpa [#allocation3 + $0x1], 0  ;;  %s992_s15 = smov 0   ;;  %s994_s16 = smov 0  }
   0x2   :  { %s996_s17 = smov 0   ;;  %s998_s18 = smov 0  }
   0x3 LB: > { %s1011_s19 = sadd.s32 4294967295, %s962_s18   ;;  %s1014_s20 = sadd.s32 1, %s962_s18   ;;  %s962_s18 = sphi %s998_s18, %s1148_s18   ;;  %s958_s17 = sphi %s996_s17, %s1147_s17   ;;  %s954_s16 = sphi %s994_s16, %s1146_s16   ;;  %s950_s15 = sphi %s992_s15, %s1145_s15  }
   0x4   : > { %s89_s21 = ssub.s32 %s962_s18, %s1014_s20  ;;  %s92_s22 = sadd.s32 1, %s958_s17 }
   0x5   : > { %p90_p0 = scmp.eq.s32.totalorder %s89_s21, 0  ;;  %p99_p1 = scmp.ne.s32.totalorder %s958_s17, %s954_s16 }
   0x6   : > { %p100_p2 = scmp.eq.s32.totalorder %s962_s18, 0  ;;  %p105_p3 = scmp.ne.s32.totalorder %s954_s16, %s950_s15 }
   0x7   : > { %s1024_s23 = scalar_select %p90_p0, %s958_s17, %s92_s22  }
   0x8   : > { %p101_p4 = por %p100_p2, %p99_p1  ;;  %p106_p5 = scmp.eq.s32.totalorder %s1011_s19, 0 }
   0x9   : > { %p853_p6 = scmp.lt.s32.totalorder %s962_s18, 2  ;;  %s171_s25 = sand.u32 1, %s958_s17  }
   0xa   : > { %p1028_p7 = por %p106_p5, %p105_p3  ;;  %s843_s26 = smul.u32 48, %s171_s25 }
   0xb   : > { %s788_s27 = smul.u32 768, %s962_s18  ;;  %p1034_p8 = pnand %p853_p6, %p101_p4 }
   0xc   : > { %s1141_s24 = scalar_select %p1028_p7, 1, 0 }
   0xd   : > { %s1041_s5 = scalar_lea.hbm %s1138_s3, %s788_s27  ;;  %s175_s6 = scalar_lea.vmem [#allocation2], %s843_s26 }
   0xe   : > { %s183_s7 = sshll.u32 %s175_s6, 4  ;;  %s1046_s8 = scalar_lea.sflag [#allocation3], %s171_s25  ;;  %s1043_s7 = int_to_ptr.vmem [resolvable:$true] %s183_s7 }
   0xf   : > { %s900_s9 = scalar_lea.hbm %s1041_s5, 768  ;;  %p902_p11 = pneg %p1034_p8 }
  0x10   : > { %p901_p10 = scmp.ne.s32.totalorder %s1041_s5, %s900_s9  ;;  %s905_s12 = scalar_lea.hbm %s1138_s3, 1536 }
  0x11   : > { %p906_p0 = scmp.lt.s32.totalorder %s1041_s5, %s1138_s3  ;;  %p907_p1 = scmp.lt.s32.totalorder %s905_s12, %s900_s9 }
  0x12   : > { %p903_p12 = pnand %p902_p11, %p901_p10 }
  0x13   : > { %p908_p2 = por %p907_p1, %p906_p0 }
  0x14   : > { %p904_p13 = pneg %p903_p12 }
  0x16   : > { %p909_p3 = pnand %p908_p2, %p904_p13 }
  0x18   : > { %912 = shalt.err (!%p909_p3)
}
  0x19   : > { %s913_s15 = scalar_lea.vmem %s1043_s7, 768  ;;  %s964_s21 = smov [#allocation2]  }
  0x1a   : > { %p914_p4 = scmp.ne.s32.totalorder %s1043_s7, %s913_s15  ;;  %s918_s22 = sshll.u32 %s964_s21, 4  ;;  %s919_s22 = int_to_ptr.vmem [resolvable:$false] %s918_s22 }
  0x1b   : > { %s920_s25 = scalar_lea.vmem %s919_s22, 1536  ;;  %p921_p10 = scmp.lt.s32.totalorder %s1043_s7, %s919_s22 }
  0x1c   : > { %p916_p5 = pnand %p914_p4, %p902_p11  ;;  %p922_p12 = scmp.lt.s32.totalorder %s920_s25, %s913_s15 }
  0x1e   : > { %p917_p6 = pneg %p916_p5  ;;  %p923_p9 = por %p922_p12, %p921_p10 }
  0x20   : > { %p924_p7 = pnand %p923_p9, %p917_p6 }
  0x22   : > { %927 = shalt.err (!%p924_p7)
}
  0x23   : > { %s965_s26 = smov 128   ;;  %s966_s27 = smov 8  }
  0x24   : > { %852 = dma.hbm_to_vmem [thread:$0]  (!%p1034_p8), %s1041_s5, 768, %s1043_s7, %s1046_s8, %s965_s26, %s965_s26, %s966_s27  }
  0x25   : > { %p191_p11 = scmp.lt.s32.totalorder %s962_s18, 3  ;;  %p1143_p13 = scmp.ge.s32.totalorder %s962_s18, 1 }
  0x27   : > { %p192_p0 = pnand %p1143_p13, %p191_p11 }
  0x28   : > { %s197_s29 = sand.u32 (!%p192_p0), 1, %s954_s16   ;;  %p1144_p7 = scmp.ne.s32.totalorder (!%p192_p0), %s1141_s24, 0 }
  0x29   : > { %195 = sbr.rel (%p192_p0) target bundleno = 689 (0x2b1), region = 36  ;;  %s198_s6 = scalar_lea.sflag (!%p192_p0), [#allocation3], %s197_s29 }
  0x2a   : > { %s844_s30 = smul.u32 (!%p192_p0), 48, %s197_s29 }
  0x2c   : > { %s1071_s9 = scalar_lea.vmem (!%p192_p0), [#allocation2], %s844_s30 }
  0x2e   : > { %945 = dma.done.wait (%p1144_p7), %s198_s6, 768  }
  0x2f   : > { %947 = vsyncadd (%p1144_p7), %s198_s6, 4294966528  ;;  %s230_s28 = smul.u32 3, %s1011_s19  ;;  %v244_v0 = vld [vmem:[%s1136_s1 + $0x8] sm:$0xff]  ;;  %v243_v1 = vld [vmem:[%s1136_s1] sm:$0xff]  ;;  %vm263_vm0 = vcmask 130048   ;;  %p238_p9 = scmp.lt.s32.totalorder %s1011_s19, 1 }
  0x30   : > { %v251_v2 = vld [vmem:[%s1071_s9] sm:$0xff]  ;;  %809 = vmatprep.subr.mxu0 %v244_v0  ;;  %v252_v5 = vld [vmem:[%s1071_s9 + $0x8] sm:$0xff]  ;;  %v253_v9 = vld [vmem:[%s1071_s9 + $0x10] sm:$0xff]  ;;  %vm690_vm13 = vcmask 0  }
  0x31   : > { %p231_p8 = scmp.lt.s32.totalorder %s230_s28, 5  ;;  %810 = vmatpush3.msra.mxu0 %v244_v0  ;;  %v254_v12 = vld [vmem:[%s1071_s9 + $0x18] sm:$0xff]  ;;  %v255_v14 = vld [vmem:[%s1071_s9 + $0x20] sm:$0xff]  ;;  %v256_v18 = vld [vmem:[%s1071_s9 + $0x28] sm:$0xff]  ;;  %s1152_s19 = smov (!%p238_p9, %s1011_s19), 1 }
  0x32   : > { %811 = vmatprep.subr.mxu0 %v243_v1  ;;  %v241_v20 = vld [vmem:[%s1135_s0] sm:$0xff]  ;;  %v242_v23 = vld [vmem:[%s1135_s0 + $0x8] sm:$0xff]  ;;  %s240_s26 = scalar_lea.vmem %s1139_s4, %s1152_s19 }
  0x33   : > { %s1150_s28 = smov (!%p231_p8, %s230_s28), 5  ;;  %812 = vmatpush3.msra.mxu0 %v243_v1  ;;  %826 = vmatprep.mubr.msk.f32.mxu1 %vm263_vm0, %v241_v20 }
  0x34   : > { %s787_s18 = sshll.u32 %s1150_s28, 4 }
  0x35   : > { %s235_s24 = scalar_lea.vmem %s1137_s2, %s787_s18 }
  0x36   : > { %v245_v3 = vld [vmem:[%s235_s24] sm:$0xff]  ;;  %v246_v4 = vld [vmem:[%s235_s24 + $0x8] sm:$0xff]  ;;  %v247_v8 = vld [vmem:[%s235_s24 + $0x10] sm:$0xff] }
  0x37   : > { %v257_v6 = vsub.f32 %v245_v3, %v251_v2  ;;  %v258_v7 = vsub.f32 %v246_v4, %v252_v5  ;;  %v248_v10 = vld [vmem:[%s235_s24 + $0x18] sm:$0xff]  ;;  %v259_v11 = vsub.f32 %v247_v8, %v253_v9  ;;  %v249_v13 = vld [vmem:[%s235_s24 + $0x20] sm:$0xff]  ;;  %v250_v17 = vld [vmem:[%s235_s24 + $0x28] sm:$0xff] }
  0x38   : > { %v260_v15 = vsub.f32 %v248_v10, %v254_v12  ;;  %v261_v16 = vsub.f32 %v249_v13, %v255_v14  ;;  %v262_v19 = vsub.f32 %v250_v17, %v256_v18 }
  0x39   : > { %813 = vmatprep.mubr.msk.f32.mxu0 %vm263_vm0, %v257_v6 }
  0x3a   : > { %814 = vmatmul.mubr.msk.f32.vlgmr.msra.gmra.mxu0 %vm263_vm0, %v258_v7 }
  0x3b   : > { %816 = vmatprep.mubr.msk.f32.mxu0 %vm263_vm0, %v259_v11 }
  0x3e   : > { %817 = vmatmul.mubr.msk.f32.gmra.mxu0 %vm263_vm0, %v260_v15 }
  0x3f   : > { %819 = vmatprep.mubr.msk.f32.mxu0 %vm263_vm0, %v261_v16 }
  0x42   : > { %820 = vmatmul.mubr.msk.f32.gmra.mxu0 %vm263_vm0, %v262_v19 }
  0xfa   : > { %v815_v21 = vpop.f32.mrf.mxu0 }
  0xfb   : > { %822 = vmatprep.subr.mxu1 %v815_v21 }
  0xfc   : > { %v348_v22 = vpop.f32.mrf.mxu0  ;;  %823 = vmatpush3.msra.mxu1 %v815_v21 }
  0xfd   : > { %824 = vmatprep.subr.mxu1 %v348_v22 }
  0xfe   : > { %v818_v24 = vpop.f32.mrf.mxu0  ;;  %825 = vmatpush3.msra.mxu1 %v348_v22 }
  0xff   : > { %827 = vmatmul.mubr.msk.f32.vlgmr.msra.gmra.mxu1 %vm263_vm0, %v242_v23  ;;  %829 = vmatprep.subr.mxu1 %v818_v24 }
 0x100   : > { %v358_v25 = vpop.f32.mrf.mxu0  ;;  %830 = vmatpush3.msra.mxu1 %v818_v24  ;;  %833 = vmatprep.mubr.msk.f32.mxu1 %vm263_vm0, %v241_v20 }
 0x101   : > { %831 = vmatprep.subr.mxu1 %v358_v25 }
 0x102   : > { %v821_v26 = vpop.f32.mrf.mxu0  ;;  %832 = vmatpush3.msra.mxu1 %v358_v25 }
 0x103   : > { %834 = vmatmul.mubr.msk.f32.vlgmr.msra.gmra.mxu1 %vm263_vm0, %v242_v23  ;;  %836 = vmatprep.subr.mxu1 %v821_v26 }
 0x104   : > { %v368_v27 = vpop.f32.mrf.mxu0  ;;  %837 = vmatpush3.msra.mxu1 %v821_v26  ;;  %840 = vmatprep.mubr.msk.f32.mxu1 %vm263_vm0, %v241_v20 }
 0x105   : > { %838 = vmatprep.subr.mxu1 %v368_v27 }
 0x106   : > { %839 = vmatpush3.msra.mxu1 %v368_v27 }
 0x107   : > { %841 = vmatmul.mubr.msk.f32.vlgmr.msra.gmra.mxu1 %vm263_vm0, %v242_v23 }
 0x1bf   : > { %v828_v28 = vpop.f32.mrf.mxu1 }
 0x1c0   : > { %v609_v29 = vsub.f32 %v258_v7, %v828_v28 }
 0x1c1   : > { %v449_v30 = vpop.f32.mrf.mxu1 }
 0x1c2   : > { %v615_v31 = vmul.f32 %v609_v29, %v609_v29  ;;  %v608_v32 = vsub.f32 %v257_v6, %v449_v30 }
 0x1c3   : > { %v835_v33 = vpop.f32.mrf.mxu1 }
 0x1c4   : > { %v621_v34 = vadd.f32 1e-06, %v615_v31  ;;  %v614_v35 = vmul.f32 %v608_v32, %v608_v32  ;;  %v611_v36 = vsub.f32 %v260_v15, %v835_v33 }
 0x1c5   : > { %v524_v37 = vpop.f32.mrf.mxu1 }
 0x1c6   : > { %888 = vrsqrt.f32 %v621_v34  ;;  %v620_v38 = vadd.f32 1e-06, %v614_v35  ;;  %v617_v39 = vmul.f32 %v611_v36, %v611_v36  ;;  %v610_v40 = vsub.f32 %v259_v11, %v524_v37 }
 0x1c7   : > { %v842_v41 = vpop.f32.mrf.mxu1  ;;  %vm635_vm1 = vcmp.eq.f32.partialorder %v621_v34, inf  ;;  %v638_v59 = vand.u32 2147483648, %v621_v34  ;;  %vm637_vm4 = vcmp.eq.f32.partialorder %v621_v34, 0.0 }
 0x1c8   : > { %890 = vrsqrt.f32 %v620_v38  ;;  %v623_v42 = vadd.f32 1e-06, %v617_v39  ;;  %v616_v43 = vmul.f32 %v610_v40, %v610_v40  ;;  %v613_v44 = vsub.f32 %v262_v19, %v842_v41 }
 0x1c9   : > { %v599_v45 = vpop.f32.mrf.mxu1  ;;  %vm628_vm2 = vcmp.eq.f32.partialorder %v620_v38, inf  ;;  %v631_v58 = vand.u32 2147483648, %v620_v38  ;;  %vm630_vm3 = vcmp.eq.f32.partialorder %v620_v38, 0.0 }
 0x1ca   : > { %892 = vrsqrt.f32 %v623_v42  ;;  %v622_v46 = vadd.f32 1e-06, %v616_v43  ;;  %v619_v47 = vmul.f32 %v613_v44, %v613_v44  ;;  %v612_v48 = vsub.f32 %v261_v16, %v599_v45 }
 0x1cb   : > { %vm649_vm5 = vcmp.eq.f32.partialorder %v623_v42, inf  ;;  %vm651_vm7 = vcmp.eq.f32.partialorder %v623_v42, 0.0  ;;  %v652_v6 = vand.u32 2147483648, %v623_v42 }
 0x1cc   : > { %894 = vrsqrt.f32 %v622_v46  ;;  %v625_v49 = vadd.f32 1e-06, %v619_v47  ;;  %v618_v50 = vmul.f32 %v612_v48, %v612_v48  ;;  %vm642_vm6 = vcmp.eq.f32.partialorder %v622_v46, inf }
 0x1cd   : > { %v645_v5 = vand.u32 2147483648, %v622_v46  ;;  %vm644_vm8 = vcmp.eq.f32.partialorder %v622_v46, 0.0 }
 0x1ce   : > { %896 = vrsqrt.f32 %v625_v49  ;;  %v624_v51 = vadd.f32 1e-06, %v618_v50  ;;  %vm663_vm9 = vcmp.eq.f32.partialorder %v625_v49, inf  ;;  %v666_v18 = vand.u32 2147483648, %v625_v49 }
 0x1cf   : > { %vm665_vm12 = vcmp.eq.f32.partialorder %v625_v49, 0.0 }
 0x1d0   : > { %898 = vrsqrt.f32 %v624_v51  ;;  %vm656_vm10 = vcmp.eq.f32.partialorder %v624_v51, inf  ;;  %v659_v17 = vand.u32 2147483648, %v624_v51  ;;  %vm658_vm11 = vcmp.eq.f32.partialorder %v624_v51, 0.0 }
 0x1d3   : > { %v889_v52 = vpop.eup %888 }
 0x1d4   : > { %v634_v53 = vmul.f32 %v889_v52, %v621_v34 }
 0x1d5   : > { %v891_v54 = vpop.eup %890 }
 0x1d6   : > { %v627_v55 = vmul.f32 %v891_v54, %v620_v38  ;;  %v636_v56 = vsel %vm635_vm1, %v621_v34, %v634_v53 }
 0x1d7   : > { %v893_v57 = vpop.eup %892  ;;  %v639_v0 = vsel %vm637_vm4, %v638_v59, %v636_v56 }
 0x1d8   : > { %v629_v60 = vsel %vm628_vm2, %v620_v38, %v627_v55  ;;  %v648_v61 = vmul.f32 %v893_v57, %v623_v42  ;;  %v669_v9 = vsel %vm263_vm0, %v639_v0, 0.0 }
 0x1d9   : > { %v895_v62 = vpop.eup %894  ;;  %v632_v63 = vsel %vm630_vm3, %v631_v58, %v629_v60 }
 0x1da   : > { %v641_v1 = vmul.f32 %v895_v62, %v622_v46  ;;  %v650_v2 = vsel %vm649_vm5, %v623_v42, %v648_v61  ;;  %v668_v3 = vsel %vm263_vm0, %v632_v63, 0.0 }
 0x1db   : > { %v897_v4 = vpop.eup %896  ;;  %v653_v12 = vsel %vm651_vm7, %v652_v6, %v650_v2  ;;  %v670_v13 = vadd.f32 %v669_v9, %v668_v3 }
 0x1dc   : > { %v643_v7 = vsel %vm642_vm6, %v622_v46, %v641_v1  ;;  %v662_v8 = vmul.f32 %v897_v4, %v625_v49  ;;  %v673_v21 = vsel %vm263_vm0, %v653_v12, 0.0 }
 0x1dd   : > { %v899_v10 = vpop.eup %898  ;;  %v646_v11 = vsel %vm644_vm8, %v645_v5, %v643_v7 }
 0x1de   : > { %v655_v14 = vmul.f32 %v899_v10, %v624_v51  ;;  %v664_v15 = vsel %vm663_vm9, %v625_v49, %v662_v8  ;;  %v671_v16 = vsel %vm263_vm0, %v646_v11, 0.0 }
 0x1df   : > { %v672_v19 = vadd.f32 %v671_v16, %v670_v13  ;;  %v667_v23 = vsel %vm665_vm12, %v666_v18, %v664_v15 }
 0x1e0   : > { %v657_v20 = vsel %vm656_vm10, %v624_v51, %v655_v14  ;;  %v677_v27 = vsel %vm263_vm0, %v667_v23, 0.0 }
 0x1e1   : > { %v660_v22 = vsel %vm658_vm11, %v659_v17, %v657_v20  ;;  %v674_v24 = vadd.f32 %v673_v21, %v672_v19 }
 0x1e2   : > { %v675_v25 = vsel %vm263_vm0, %v660_v22, 0.0 }
 0x1e3   : > { %v676_v26 = vadd.f32 %v675_v25, %v674_v24 }
 0x1e5   : > { %v678_v28 = vadd.f32 %v677_v27, %v676_v26 }
 0x1e7   : > { %679 = vadd.xlane.f32.xlu0 %v678_v28 }
 0x270   : > { %v680_v29 = vpop.xlane.xlu0 %679 }
 0x271   : > { %v681_v30 = vrot.slane %v680_v29, 4 }
 0x273   : > { %v682_v31 = vadd.f32 %v681_v30, %v680_v29 }
 0x275   : > { %v683_v32 = vrot.slane %v682_v31, 2 }
 0x277   : > { %v684_v33 = vadd.f32 %v683_v32, %v682_v31 }
 0x279   : > { %v685_v34 = vrot.slane %v684_v33, 1 }
 0x27b   : > { %v686_v35 = vadd.f32 %v685_v34, %v684_v33 }
 0x27d   : > { %845 = vpush %v686_v35 }
 0x2ae   : > { %s846_s27 = spop %845 }
 0x2af   : > { %v688_v36 = vstv %s846_s27 }
 0x2b0   : > { %691 = vst.msk [vmem:[%s240_s26] sm:$0x1] %vm690_vm13, %v688_v36 }
 0x2b1 PF: > { %p14_p1 = scmp.ge.s32.totalorder %s1014_s20, 4   ;;  %s1145_s15 = smov %s954_s16 }
 0x2b2   : > { %s1146_s16 = smov %s958_s17  ;;  %s1147_s17 = smov %s1024_s23 }
 0x2b3   : > { %s1148_s18 = smov %s1014_s20  ;;  %16 = sbr.rel (!%p14_p1) target bundleno = 3 (0x3), region = 79 }
 0x2b8   :  { %709 = vsyncpa [#allocation3], 1 }
 0x2b9   :  { %711 = vsyncpa [#allocation3 + $0x1], 1 }

</bundles_post_ra>
